<compile_context>
chip_gen: v5e
topology: v5e:2x2
jax: 0.10.0
libtpu: 0.0.40
codegen_flags: <defaults>
</compile_context>

<pallas_src>
import functools

import jax
import jax.numpy as jnp
from jax.experimental import pallas as pl
from jax.experimental.pallas import tpu as pltpu

LANE = 128      # f32 lane width
SUBLANE = 8     # f32 sublane width
DEFAULT_TILE_B = 512


def _round_up(n, m):
    return ((n + m - 1) // m) * m


def qnet_kernel(x_ref, w1_ref, b1_ref, w2_ref, b2_ref, o_ref):
    # fc1 on the MXU (f32 accumulate); bias add + ReLU on the VPU (free slots
    # while the MXU is latency-bound at this tiny K).
    h = jnp.dot(x_ref[...], w1_ref[...], preferred_element_type=jnp.float32)
    h = jnp.maximum(h + b1_ref[...], 0.0)
    # fc2 on the MXU into a lane-padded (128-wide) slab, bias add on the VPU,
    # unmasked lane-dense store.
    out = jnp.dot(h, w2_ref[...], preferred_element_type=jnp.float32)
    o_ref[...] = (out + b2_ref[...]).astype(o_ref.dtype)


def fold_params(w1, b1, w2, b2):
    """One-time layout prep (per parameter update, NOT per forward call).

    Zero-pads fc2 weight/bias to a multiple-of-128 output width so the kernel's
    output slab is lane-dense (unmasked stores); the wrapper slices it back to
    action_dim.  fc1 params are used as-is.
    """
    hidden_dim = w1.shape[1]
    action_dim = w2.shape[1]
    out_pad = _round_up(action_dim, LANE)
    b1_r = b1.reshape(1, hidden_dim)
    w2_p = jnp.pad(w2, ((0, 0), (0, out_pad - action_dim)))
    b2_p = jnp.pad(b2.reshape(1, action_dim), ((0, 0), (0, out_pad - action_dim)))
    return w1, b1_r, w2_p, b2_p


@functools.partial(jax.jit, static_argnames=("action_dim", "tile_b"))
def qnet_forward_folded(x, w1, b1, w2_p, b2_p, *, action_dim, tile_b=DEFAULT_TILE_B):
    """x: [B, state_dim] f32 -> [B, action_dim] f32, using pre-folded params."""
    batch, state_dim = x.shape
    hidden_dim = w1.shape[1]
    out_pad = w2_p.shape[1]

    # Batch tile: multiple of the f32 sublane, capped so each grid step's VMEM
    # footprint stays tiny; big enough that per-step overhead (~0.35 µs) is
    # amortized for training-sized replay batches.
    tb = min(_round_up(batch, SUBLANE), tile_b)
    padded_b = _round_up(batch, tb)
    if padded_b != batch:
        x = jnp.pad(x, ((0, padded_b - batch), (0, 0)))
    grid = (padded_b // tb,)

    # Advisory cost so XLA treats this as the ~µs op it is and overlaps neighbors.
    flops = 2 * padded_b * (state_dim * hidden_dim + hidden_dim * out_pad)
    bytes_accessed = 4 * (
        padded_b * state_dim + w1.size + b1.size + w2_p.size + b2_p.size
        + padded_b * out_pad
    )

    out = pl.pallas_call(
        qnet_kernel,
        out_shape=jax.ShapeDtypeStruct((padded_b, out_pad), jnp.float32),
        grid_spec=pltpu.PrefetchScalarGridSpec(
            num_scalar_prefetch=0,
            grid=grid,
            in_specs=[
                # x: tiled over batch, auto double-buffered per grid step.
                pl.BlockSpec((tb, state_dim), lambda i: (i, 0)),
                # Weights/biases: same block every step -> resident in VMEM.
                pl.BlockSpec((state_dim, hidden_dim), lambda i: (0, 0)),
                pl.BlockSpec((1, hidden_dim), lambda i: (0, 0)),
                pl.BlockSpec((hidden_dim, out_pad), lambda i: (0, 0)),
                pl.BlockSpec((1, out_pad), lambda i: (0, 0)),
            ],
            out_specs=pl.BlockSpec((tb, out_pad), lambda i: (i, 0)),
        ),
        compiler_params=pltpu.CompilerParams(
            dimension_semantics=("parallel",),   # shard batch steps across TCs on v7x
        ),
        cost_estimate=pl.CostEstimate(
            flops=flops, transcendentals=0, bytes_accessed=bytes_accessed
        ),
    )(x, w1, b1, w2_p, b2_p)

    # Drop batch padding and the zero lane-padding of the output.
    return out[:batch, :action_dim]


def qnet_forward(x, w1, b1, w2, b2):
    """Convenience wrapper matching Qnet.forward: relu(x @ w1 + b1) @ w2 + b2."""
    w1f, b1f, w2_p, b2_p = fold_params(w1, b1, w2, b2)
    return qnet_forward_folded(x, w1f, b1f, w2_p, b2_p, action_dim=w2.shape[1])


def init_params(key, state_dim, hidden_dim, action_dim):
    """Deterministic init mirroring torch.nn.Linear's U(-1/sqrt(fan_in), 1/sqrt(fan_in))."""
    k1, k2, k3, k4 = jax.random.split(key, 4)
    bound1 = 1.0 / jnp.sqrt(jnp.float32(state_dim))
    bound2 = 1.0 / jnp.sqrt(jnp.float32(hidden_dim))
    w1 = jax.random.uniform(k1, (state_dim, hidden_dim), jnp.float32, -bound1, bound1)
    b1 = jax.random.uniform(k2, (1, hidden_dim), jnp.float32, -bound1, bound1)
    w2 = jax.random.uniform(k3, (hidden_dim, action_dim), jnp.float32, -bound2, bound2)
    b2 = jax.random.uniform(k4, (1, action_dim), jnp.float32, -bound2, bound2)
    return w1, b1, w2, b2


if __name__ == "__main__":
    # CartPole-v1: state_dim=4, action_dim=2; hidden_dim=128 as in the module.
    batch, state_dim, hidden_dim, action_dim = 8, 4, 128, 2

    key = jax.random.PRNGKey(0)
    k_params, k_x = jax.random.split(key)
    w1, b1, w2, b2 = init_params(k_params, state_dim, hidden_dim, action_dim)
    x = jax.random.normal(k_x, (batch, state_dim), jnp.float32)

    out = jax.block_until_ready(qnet_forward(x, w1, b1, w2, b2))

    # Pure-JAX reference check (acting path, tiny batch).
    ref = jnp.maximum(x @ w1 + b1, 0.0) @ w2 + b2
    assert out.shape == (batch, action_dim)
    assert jnp.allclose(out, ref, atol=1e-5, rtol=1e-5)

    # Training path: replay-buffer-sized batch exercises the tiled/parallel grid
    # (non-multiple of the tile to cover batch padding + output slicing).
    xb = jax.random.normal(jax.random.PRNGKey(1), (1000, state_dim), jnp.float32)
    outb = jax.block_until_ready(qnet_forward(xb, w1, b1, w2, b2))
    refb = jnp.maximum(xb @ w1 + b1, 0.0) @ w2 + b2
    assert outb.shape == (1000, action_dim)
    assert jnp.allclose(outb, refb, atol=1e-5, rtol=1e-5)

    print("KERNEL_OK")
</pallas_src>

<mosaic_0001>
module attributes {stable_mosaic.version = 11 : i64} {
  func.func @qnet_kernel(%arg0: i32, %arg1: memref<8x4xf32, #tpu.memory_space<vmem>>, %arg2: memref<4x128xf32, #tpu.memory_space<vmem>>, %arg3: memref<1x128xf32, #tpu.memory_space<vmem>>, %arg4: memref<128x128xf32, #tpu.memory_space<vmem>>, %arg5: memref<1x128xf32, #tpu.memory_space<vmem>>, %arg6: memref<8x128xf32, #tpu.memory_space<vmem>>) attributes {dimension_semantics = [#tpu.dimension_semantics<parallel>], iteration_bounds = array<i64: 1>, scalar_prefetch = 0 : i64, scratch_operands = 0 : i64, tpu.core_type = #tpu.core_type<tc>, window_params = [{transform_indices = @transform_0, window_bounds = array<i64: 8, 4>}, {pipeline_mode = #tpu.pipeline_mode<synchronous>, transform_indices = @transform_1, window_bounds = array<i64: 4, 128>}, {pipeline_mode = #tpu.pipeline_mode<synchronous>, transform_indices = @transform_2, window_bounds = array<i64: 1, 128>}, {pipeline_mode = #tpu.pipeline_mode<synchronous>, transform_indices = @transform_3, window_bounds = array<i64: 128, 128>}, {pipeline_mode = #tpu.pipeline_mode<synchronous>, transform_indices = @transform_4, window_bounds = array<i64: 1, 128>}, {transform_indices = @transform_5, window_bounds = array<i64: 8, 128>}]} {
    %c0 = arith.constant 0 : index
    %c0_0 = arith.constant 0 : index
    %0 = vector.load %arg1[%c0, %c0_0] : memref<8x4xf32, #tpu.memory_space<vmem>>, vector<8x4xf32>
    %c0_1 = arith.constant 0 : index
    %c0_2 = arith.constant 0 : index
    %1 = vector.load %arg2[%c0_1, %c0_2] : memref<4x128xf32, #tpu.memory_space<vmem>>, vector<4x128xf32>
    %cst = arith.constant dense<0.000000e+00> : vector<8x128xf32>
    %2 = tpu.matmul %0, %1, %cst {dimension_numbers = #tpu.dot_dimension_numbers<[1], [0], [0], [1], [0, 0, 1, 1], [], []>} : vector<8x4xf32>, vector<4x128xf32>, vector<8x128xf32> -> vector<8x128xf32>
    %c0_3 = arith.constant 0 : index
    %c0_4 = arith.constant 0 : index
    %3 = vector.load %arg3[%c0_3, %c0_4] : memref<1x128xf32, #tpu.memory_space<vmem>>, vector<1x128xf32>
    %4 = vector.broadcast %3 : vector<1x128xf32> to vector<8x128xf32>
    %5 = arith.addf %2, %4 : vector<8x128xf32>
    %cst_5 = arith.constant 0.000000e+00 : f32
    %6 = vector.broadcast %cst_5 : f32 to vector<8x128xf32>
    %7 = arith.maximumf %5, %6 : vector<8x128xf32>
    %c0_6 = arith.constant 0 : index
    %c0_7 = arith.constant 0 : index
    %8 = vector.load %arg4[%c0_6, %c0_7] : memref<128x128xf32, #tpu.memory_space<vmem>>, vector<128x128xf32>
    %cst_8 = arith.constant dense<0.000000e+00> : vector<8x128xf32>
    %9 = tpu.matmul %7, %8, %cst_8 {dimension_numbers = #tpu.dot_dimension_numbers<[1], [0], [0], [1], [0, 0, 1, 1], [], []>} : vector<8x128xf32>, vector<128x128xf32>, vector<8x128xf32> -> vector<8x128xf32>
    %c0_9 = arith.constant 0 : index
    %c0_10 = arith.constant 0 : index
    %10 = vector.load %arg5[%c0_9, %c0_10] : memref<1x128xf32, #tpu.memory_space<vmem>>, vector<1x128xf32>
    %11 = vector.broadcast %10 : vector<1x128xf32> to vector<8x128xf32>
    %12 = arith.addf %9, %11 : vector<8x128xf32>
    %c0_11 = arith.constant 0 : index
    %c0_12 = arith.constant 0 : index
    %13 = vector.load %arg6[%c0_11, %c0_12] : memref<8x128xf32, #tpu.memory_space<vmem>>, vector<8x128xf32>
    tpu.vector_store %arg6[%c0_11, %c0_12], %12 {strides = array<i32>} : memref<8x128xf32, #tpu.memory_space<vmem>>, vector<8x128xf32>,
    return
  }
  func.func @transform_0(%arg0: i32) -> (i32, i32) {
    %c0_i32 = arith.constant 0 : i32
    %c0_i32_0 = arith.constant 0 : i32
    return %arg0, %c0_i32 : i32, i32
  }
  func.func @transform_1(%arg0: i32) -> (i32, i32) {
    %c0_i32 = arith.constant 0 : i32
    %c0_i32_0 = arith.constant 0 : i32
    %c0_i32_1 = arith.constant 0 : i32
    return %c0_i32, %c0_i32_0 : i32, i32
  }
  func.func @transform_2(%arg0: i32) -> (i32, i32) {
    %c0_i32 = arith.constant 0 : i32
    %c0_i32_0 = arith.constant 0 : i32
    %c0_i32_1 = arith.constant 0 : i32
    return %c0_i32, %c0_i32_0 : i32, i32
  }
  func.func @transform_3(%arg0: i32) -> (i32, i32) {
    %c0_i32 = arith.constant 0 : i32
    %c0_i32_0 = arith.constant 0 : i32
    %c0_i32_1 = arith.constant 0 : i32
    return %c0_i32, %c0_i32_0 : i32, i32
  }
  func.func @transform_4(%arg0: i32) -> (i32, i32) {
    %c0_i32 = arith.constant 0 : i32
    %c0_i32_0 = arith.constant 0 : i32
    %c0_i32_1 = arith.constant 0 : i32
    return %c0_i32, %c0_i32_0 : i32, i32
  }
  func.func @transform_5(%arg0: i32) -> (i32, i32) {
    %c0_i32 = arith.constant 0 : i32
    %c0_i32_0 = arith.constant 0 : i32
    return %arg0, %c0_i32 : i32, i32
  }
}

</mosaic_0001>

<bundles_post_ra>
// kernel: qnet_forward_folded.1
= control target key start
LH: loop header
LB: loop body
LE: loop exit
PB: predicated region body
PF: predicated region fallthrough
CT: control target
= control target key end

     0   :  { %10 = vsyncpa [#allocation3], 0  ;;  %s150_s21 = smov [#allocation2]   ;;  %s151_s23 = smov 128   ;;  %s201_s0 = inlined_call_operand.vmem [shape: f32[8,4], index: 0, kind: input, shape index: {}]   ;;  %s202_s1 = inlined_call_operand.vmem [shape: f32[4,128], index: 1, kind: input, shape index: {}]   ;;  %s203_s2 = inlined_call_operand.vmem [shape: f32[1,128], index: 2, kind: input, shape index: {}]   ;;  %s204_s3 = inlined_call_operand.hbm [shape: f32[128,128], index: 3, kind: input, shape index: {}]   ;;  %s205_s4 = inlined_call_operand.vmem [shape: f32[1,128], index: 4, kind: input, shape index: {}]   ;;  %s206_s5 = inlined_call_operand.vmem [shape: f32[8,128], index: 5, kind: output, shape index: {}]  }
   0x1   :  { %s21_s20 = sshll.u32 %s204_s3, 4  ;;  %s23_s22 = sshll.u32 %s150_s21, 4  ;;  %s22_s20 = int_to_ptr.hbm [resolvable:$true] %s21_s20  ;;  %s24_s22 = int_to_ptr.vmem [resolvable:$true] %s23_s22 }
   0x2   :  { %s152_s24 = smov 8  }
   0x3   :  { %29 = dma.hbm_to_vmem [thread:$0]  %s22_s20, 2048, %s24_s22, [#allocation3], %s151_s23, %s151_s23, %s152_s24  }
   0x4   :  { %148 = dma.done.wait [#allocation3], 2048  }
   0x5   :  { %149 = vsyncadd [#allocation3], 4294965248  ;;  %vm46_vm0 = vcmask 1043456   ;;  %vm42_vm1 = vcmask 31744   ;;  %v37_v0 = vld [vmem:[%s202_s1] sm:$0xf] }
   0x6   :  { %v36_v1 = vld [vmem:[%s201_s0] sm:$0xff]  ;;  %v86_v2 = vld [vmem:[#allocation2 + $0x78] sm:$0xff]  ;;  %117 = vmatpush.msk.msra.mxu0 %vm46_vm0, %v37_v0  ;;  %v85_v3 = vld [vmem:[#allocation2 + $0x70] sm:$0xff] }
   0x7   :  { %91 = vmatpush.msra.mxu1 %v86_v2  ;;  %118 = vmatmul.msk.f32.vlgmr.msra.gmra.mxu0 %vm42_vm1, %v36_v1  ;;  %v84_v4 = vld [vmem:[#allocation2 + $0x68] sm:$0xff]  ;;  %v83_v5 = vld [vmem:[#allocation2 + $0x60] sm:$0xff]  ;;  %v82_v6 = vld [vmem:[#allocation2 + $0x58] sm:$0xff] }
   0x8   :  { %v81_v7 = vld [vmem:[#allocation2 + $0x50] sm:$0xff]  ;;  %v80_v8 = vld [vmem:[#allocation2 + $0x48] sm:$0xff]  ;;  %v79_v9 = vld [vmem:[#allocation2 + $0x40] sm:$0xff] }
   0x9   :  { %92 = vmatpush.msra.mxu1 %v85_v3  ;;  %v78_v10 = vld [vmem:[#allocation2 + $0x38] sm:$0xff]  ;;  %v77_v11 = vld [vmem:[#allocation2 + $0x30] sm:$0xff]  ;;  %v76_v12 = vld [vmem:[#allocation2 + $0x28] sm:$0xff] }
   0xa   :  { %v75_v13 = vld [vmem:[#allocation2 + $0x20] sm:$0xff]  ;;  %v74_v14 = vld [vmem:[#allocation2 + $0x18] sm:$0xff]  ;;  %v73_v15 = vld [vmem:[#allocation2 + $0x10] sm:$0xff] }
   0xb   :  { %93 = vmatpush.msra.mxu1 %v84_v4  ;;  %v72_v16 = vld [vmem:[#allocation2 + $0x8] sm:$0xff]  ;;  %v71_v17 = vld [vmem:[#allocation2] sm:$0xff] }
   0xc   :  { %v122_v18 = vld [vmem:[%s203_s2] ss:$0 sm:$0xff] }
   0xd   :  { %94 = vmatpush.msra.mxu1 %v83_v5  ;;  %v123_v22 = vld [vmem:[%s205_s4] ss:$0 sm:$0xff] }
   0xf   :  { %95 = vmatpush.msra.mxu1 %v82_v6 }
  0x11   :  { %96 = vmatpush.msra.mxu1 %v81_v7 }
  0x13   :  { %97 = vmatpush.msra.mxu1 %v80_v8 }
  0x15   :  { %98 = vmatpush.msra.mxu1 %v79_v9 }
  0x17   :  { %99 = vmatpush.msra.mxu1 %v78_v10 }
  0x19   :  { %100 = vmatpush.msra.mxu1 %v77_v11 }
  0x1b   :  { %101 = vmatpush.msra.mxu1 %v76_v12 }
  0x1d   :  { %102 = vmatpush.msra.mxu1 %v75_v13 }
  0x1f   :  { %103 = vmatpush.msra.mxu1 %v74_v14 }
  0x21   :  { %104 = vmatpush.msra.mxu1 %v73_v15 }
  0x23   :  { %105 = vmatpush.msra.mxu1 %v72_v16 }
  0x25   :  { %106 = vmatpush.msra.mxu1 %v71_v17 }
  0x84   :  { %v67_v19 = vpop.f32.mrf.mxu0 }
  0x85   :  { %v68_v20 = vadd.f32 %v122_v18, %v67_v19 }
  0x87   :  { %v70_v21 = vmax.f32 %v68_v20, 0.0 }
  0x89   :  { %107 = vmatmul.f32.vlgmr.msra.gmra.mxu1 %v70_v21 }
 0x106   :  { %v108_v23 = vpop.f32.mrf.mxu1 }
 0x107   :  { %v109_v24 = vadd.f32 %v123_v22, %v108_v23 }
 0x109   :  { %111 = vst [vmem:[%s206_s5] sm:$0xff] %v109_v24 }
 0x10a   :  { %116 = vsyncpa [#allocation3], 1 }

</bundles_post_ra>
